<compile_context>
chip_gen: v6e
topology: v6e:2x2x1
jax: 0.10.0
libtpu: 0.0.40
codegen_flags: <defaults>
</compile_context>

<pallas_src>
import functools

import jax
import jax.numpy as jnp
from jax.experimental import pallas as pl
from jax.experimental.pallas import tpu as pltpu


def _round_up(x, m):
    return ((x + m - 1) // m) * m


# ----------------------------------------------------------------------------
# Parameter construction (PyTorch nn.Linear-style init, then fuse + pad).
# Weights are stored transposed ([in, out]) so the kernel computes x @ W + b.
# ----------------------------------------------------------------------------
def init_params(key, state_dim, action_dim, hidden_dim=128):
    s_pad = _round_up(state_dim, 16)          # bf16 sublane multiple only
    h_pad = _round_up(hidden_dim, 128)
    o_pad = _round_up(2 * action_dim, 128)

    def linear(k, fan_in, fan_out):
        kw, kb = jax.random.split(k)
        bound = 1.0 / jnp.sqrt(jnp.float32(fan_in))
        w = jax.random.uniform(kw, (fan_in, fan_out), jnp.float32, -bound, bound)
        b = jax.random.uniform(kb, (fan_out,), jnp.float32, -bound, bound)
        return w, b

    k1, k2, k3, k4 = jax.random.split(key, 4)
    w1, b1 = linear(k1, state_dim, hidden_dim)
    w2, b2 = linear(k2, hidden_dim, hidden_dim)
    wmu, bmu = linear(k3, hidden_dim, action_dim)
    wsig, bsig = linear(k4, hidden_dim, action_dim)

    # Fuse the two heads: columns [0, A) -> mu, [A, 2A) -> sigma-logits.
    wh = jnp.concatenate([wmu, wsig], axis=1)
    bh = jnp.concatenate([bmu, bsig], axis=0)

    pad2 = lambda w, r, c: jnp.pad(w, ((0, r - w.shape[0]), (0, c - w.shape[1])))
    pad1 = lambda b, c: jnp.pad(b, (0, c - b.shape[0])).reshape(1, c)

    return dict(
        # bf16 weights: half the HBM->VMEM DMA bytes, native MXU datapath.
        w1=pad2(w1, s_pad, h_pad).astype(jnp.bfloat16),
        w2=pad2(w2, h_pad, h_pad).astype(jnp.bfloat16),
        wh=pad2(wh, h_pad, o_pad).astype(jnp.bfloat16),
        # f32 biases (VPU/EUP math stays f32; v5e has no bf16 VALU/EUP).
        b1=pad1(b1, h_pad),
        b2=pad1(b2, h_pad),
        bh=pad1(bh, o_pad),
        state_dim=state_dim,
        action_dim=action_dim,
        hidden_dim=hidden_dim,
    )


# ----------------------------------------------------------------------------
# Kernel: fc1 -> relu -> fc2 -> relu -> fused (mu || softplus+0.01) head.
# One lane-dense [TM, O_pad] output; mu/sigma are split in the wrapper.
# ----------------------------------------------------------------------------
def _actor_kernel(state_ref, w1_ref, b1_ref, w2_ref, b2_ref, wh_ref, bh_ref,
                  out_ref, *, action_dim):
    bf16 = jnp.bfloat16
    x = state_ref[...].astype(bf16)

    h1 = jnp.dot(x, w1_ref[...], preferred_element_type=jnp.float32) + b1_ref[...]
    h1 = jnp.maximum(h1, 0.0)

    h2 = jnp.dot(h1.astype(bf16), w2_ref[...],
                 preferred_element_type=jnp.float32) + b2_ref[...]
    h2 = jnp.maximum(h2, 0.0)

    z = jnp.dot(h2.astype(bf16), wh_ref[...],
                preferred_element_type=jnp.float32) + bh_ref[...]

    # cols [0, A): mu (identity); cols [A, 2A): sigma = softplus(z) + 0.01.
    col = jax.lax.broadcasted_iota(jnp.int32, z.shape, 1)
    sigma = jnp.logaddexp(z, 0.0) + 0.01          # numerically-stable softplus (EUP)
    is_sigma = (col >= action_dim) & (col < 2 * action_dim)
    out_ref[...] = jnp.where(is_sigma, sigma, z).astype(out_ref.dtype)


def actor_forward_packed(state, params, *, max_block_batch=1024,
                         out_dtype=jnp.bfloat16):
    """Returns the packed, lane-dense head slab [b_pad, o_pad]:
    columns [0, A) = mu, [A, 2A) = sigma; remaining columns are padding."""
    w1, b1 = params["w1"], params["b1"]
    w2, b2 = params["w2"], params["b2"]
    wh, bh = params["wh"], params["bh"]
    a_dim = params["action_dim"]

    B, S = state.shape
    s_pad, h_pad = w1.shape
    o_pad = wh.shape[1]

    # Balanced batch tiling: tm is a multiple of 8, tiles are even-sized, and
    # whenever B >= 256 we force >= 2 grid steps so v7x's two TensorCores both
    # get work.  Batch pad is at most 7 rows per tile.
    min_tiles = 2 if B >= 256 else 1
    num_tiles = max(pl.cdiv(B, max_block_batch), min_tiles)
    tm = _round_up(pl.cdiv(B, num_tiles), 8)
    num_tiles = pl.cdiv(B, tm)
    b_pad = num_tiles * tm

    if b_pad != B or s_pad != S:
        state = jnp.pad(state, ((0, b_pad - B), (0, s_pad - S)))

    const2d = lambda arr: pl.BlockSpec(arr.shape, lambda i: (0, 0))
    out_bytes = jnp.dtype(out_dtype).itemsize

    cost = pl.CostEstimate(
        flops=2 * b_pad * (s_pad * h_pad + h_pad * h_pad + h_pad * o_pad),
        transcendentals=2 * b_pad * o_pad,
        bytes_accessed=(b_pad * s_pad * 4
                        + (w1.size + w2.size + wh.size) * 2
                        + (b1.size + b2.size + bh.size) * 4
                        + b_pad * o_pad * out_bytes),
    )

    out = pl.pallas_call(
        functools.partial(_actor_kernel, action_dim=a_dim),
        out_shape=jax.ShapeDtypeStruct((b_pad, o_pad), out_dtype),
        grid_spec=pltpu.PrefetchScalarGridSpec(
            num_scalar_prefetch=0,
            grid=(num_tiles,),
            in_specs=[
                # State tile: last dim == full array extent (no 128-pad).
                pl.BlockSpec((tm, s_pad), lambda i: (i, 0)),
                const2d(w1), const2d(b1),          # resident weights/biases
                const2d(w2), const2d(b2),
                const2d(wh), const2d(bh),
            ],
            out_specs=pl.BlockSpec((tm, o_pad), lambda i: (i, 0)),
        ),
        compiler_params=pltpu.CompilerParams(
            dimension_semantics=("parallel",)),
        cost_estimate=cost,
    )(state, w1, b1, w2, b2, wh, bh)
    return out


def actor_forward(state, params, **kwargs):
    """state: [B, state_dim] float32.  Returns (mu [B, A], sigma [B, A])."""
    a_dim = params["action_dim"]
    B = state.shape[0]
    out = actor_forward_packed(state, params, **kwargs)
    packed = out[:B, :2 * a_dim]
    return packed[:, :a_dim], packed[:, a_dim:]


# ----------------------------------------------------------------------------
# Pure-JAX reference (same bf16-MXU / f32-accumulate numerics).
# ----------------------------------------------------------------------------
def actor_forward_ref(state, params):
    bf16 = jnp.bfloat16
    a_dim = params["action_dim"]
    s_pad = params["w1"].shape[0]
    x = jnp.pad(state, ((0, 0), (0, s_pad - state.shape[1])))

    h1 = jnp.maximum(jnp.dot(x.astype(bf16), params["w1"],
                             preferred_element_type=jnp.float32) + params["b1"], 0.0)
    h2 = jnp.maximum(jnp.dot(h1.astype(bf16), params["w2"],
                             preferred_element_type=jnp.float32) + params["b2"], 0.0)
    z = jnp.dot(h2.astype(bf16), params["wh"],
                preferred_element_type=jnp.float32) + params["bh"]
    mu = z[:, :a_dim]
    sigma = jax.nn.softplus(z[:, a_dim:2 * a_dim]) + 0.01
    return mu, sigma


if __name__ == "__main__":
    state_dim, action_dim, hidden_dim = 16, 8, 128   # module default hidden_dim=128

    key = jax.random.PRNGKey(0)
    kp, ks1, ks2 = jax.random.split(key, 3)
    params = init_params(kp, state_dim, action_dim, hidden_dim)

    # --- test 1: small batch, default bf16 output slab --------------------
    batch = 8
    state = jax.random.normal(ks1, (batch, state_dim), jnp.float32)
    mu, sigma = actor_forward(state, params)
    jax.block_until_ready((mu, sigma))
    mu_ref, sigma_ref = actor_forward_ref(state, params)
    assert mu.shape == (batch, action_dim) and sigma.shape == (batch, action_dim)
    assert jnp.allclose(mu.astype(jnp.float32), mu_ref, atol=2e-2, rtol=2e-2)
    assert jnp.allclose(sigma.astype(jnp.float32), sigma_ref, atol=2e-2, rtol=2e-2)
    assert bool(jnp.all(sigma.astype(jnp.float32) > 0.0))

    # --- test 2: awkward batch (2 balanced tiles, >=2 parallel grid steps),
    #             f32 output for tight numerical check -----------------------
    batch2 = 300
    state2 = jax.random.normal(ks2, (batch2, state_dim), jnp.float32)
    mu2, sigma2 = actor_forward(state2, params, out_dtype=jnp.float32)
    jax.block_until_ready((mu2, sigma2))
    mu2_ref, sigma2_ref = actor_forward_ref(state2, params)
    assert mu2.shape == (batch2, action_dim) and sigma2.shape == (batch2, action_dim)
    assert jnp.allclose(mu2, mu2_ref, atol=1e-3, rtol=1e-3)
    assert jnp.allclose(sigma2, sigma2_ref, atol=1e-3, rtol=1e-3)
    assert bool(jnp.all(sigma2 > 0.0))

    # TODO(synk): sample() (Normal sampling / log_prob / entropy) is host-side
    # distribution glue; could later be fused in-kernel via pltpu.prng_seed /
    # pltpu.prng_random_bits so mu/sigma never round-trip to HBM.

    print("KERNEL_OK")
</pallas_src>

<mosaic_0001>
module attributes {stable_mosaic.version = 11 : i64} {
  func.func @_actor_kernel(%arg0: i32, %arg1: memref<8x16xf32, #tpu.memory_space<vmem>>, %arg2: memref<16x128xbf16, #tpu.memory_space<vmem>>, %arg3: memref<1x128xf32, #tpu.memory_space<vmem>>, %arg4: memref<128x128xbf16, #tpu.memory_space<vmem>>, %arg5: memref<1x128xf32, #tpu.memory_space<vmem>>, %arg6: memref<128x128xbf16, #tpu.memory_space<vmem>>, %arg7: memref<1x128xf32, #tpu.memory_space<vmem>>, %arg8: memref<8x128xbf16, #tpu.memory_space<vmem>>) attributes {dimension_semantics = [#tpu.dimension_semantics<parallel>], iteration_bounds = array<i64: 1>, scalar_prefetch = 0 : i64, scratch_operands = 0 : i64, tpu.core_type = #tpu.core_type<tc>, window_params = [{transform_indices = @transform_0, window_bounds = array<i64: 8, 16>}, {pipeline_mode = #tpu.pipeline_mode<synchronous>, transform_indices = @transform_1, window_bounds = array<i64: 16, 128>}, {pipeline_mode = #tpu.pipeline_mode<synchronous>, transform_indices = @transform_2, window_bounds = array<i64: 1, 128>}, {pipeline_mode = #tpu.pipeline_mode<synchronous>, transform_indices = @transform_3, window_bounds = array<i64: 128, 128>}, {pipeline_mode = #tpu.pipeline_mode<synchronous>, transform_indices = @transform_4, window_bounds = array<i64: 1, 128>}, {pipeline_mode = #tpu.pipeline_mode<synchronous>, transform_indices = @transform_5, window_bounds = array<i64: 128, 128>}, {pipeline_mode = #tpu.pipeline_mode<synchronous>, transform_indices = @transform_6, window_bounds = array<i64: 1, 128>}, {transform_indices = @transform_7, window_bounds = array<i64: 8, 128>}]} {
    %c0 = arith.constant 0 : index
    %c0_0 = arith.constant 0 : index
    %0 = vector.load %arg1[%c0, %c0_0] : memref<8x16xf32, #tpu.memory_space<vmem>>, vector<8x16xf32>
    %1 = arith.truncf %0 : vector<8x16xf32> to vector<8x16xbf16>
    %c0_1 = arith.constant 0 : index
    %c0_2 = arith.constant 0 : index
    %2 = vector.load %arg2[%c0_1, %c0_2] : memref<16x128xbf16, #tpu.memory_space<vmem>>, vector<16x128xbf16>
    %cst = arith.constant dense<0.000000e+00> : vector<8x128xf32>
    %3 = tpu.matmul %1, %2, %cst {dimension_numbers = #tpu.dot_dimension_numbers<[1], [0], [0], [1], [0, 0, 1, 1], [], []>} : vector<8x16xbf16>, vector<16x128xbf16>, vector<8x128xf32> -> vector<8x128xf32>
    %c0_3 = arith.constant 0 : index
    %c0_4 = arith.constant 0 : index
    %4 = vector.load %arg3[%c0_3, %c0_4] : memref<1x128xf32, #tpu.memory_space<vmem>>, vector<1x128xf32>
    %5 = vector.broadcast %4 : vector<1x128xf32> to vector<8x128xf32>
    %6 = arith.addf %3, %5 : vector<8x128xf32>
    %cst_5 = arith.constant 0.000000e+00 : f32
    %7 = vector.broadcast %cst_5 : f32 to vector<8x128xf32>
    %8 = arith.maximumf %6, %7 : vector<8x128xf32>
    %9 = arith.truncf %8 : vector<8x128xf32> to vector<8x128xbf16>
    %c0_6 = arith.constant 0 : index
    %c0_7 = arith.constant 0 : index
    %10 = vector.load %arg4[%c0_6, %c0_7] : memref<128x128xbf16, #tpu.memory_space<vmem>>, vector<128x128xbf16>
    %cst_8 = arith.constant dense<0.000000e+00> : vector<8x128xf32>
    %11 = tpu.matmul %9, %10, %cst_8 {dimension_numbers = #tpu.dot_dimension_numbers<[1], [0], [0], [1], [0, 0, 1, 1], [], []>} : vector<8x128xbf16>, vector<128x128xbf16>, vector<8x128xf32> -> vector<8x128xf32>
    %c0_9 = arith.constant 0 : index
    %c0_10 = arith.constant 0 : index
    %12 = vector.load %arg5[%c0_9, %c0_10] : memref<1x128xf32, #tpu.memory_space<vmem>>, vector<1x128xf32>
    %13 = vector.broadcast %12 : vector<1x128xf32> to vector<8x128xf32>
    %14 = arith.addf %11, %13 : vector<8x128xf32>
    %cst_11 = arith.constant 0.000000e+00 : f32
    %15 = vector.broadcast %cst_11 : f32 to vector<8x128xf32>
    %16 = arith.maximumf %14, %15 : vector<8x128xf32>
    %17 = arith.truncf %16 : vector<8x128xf32> to vector<8x128xbf16>
    %c0_12 = arith.constant 0 : index
    %c0_13 = arith.constant 0 : index
    %18 = vector.load %arg6[%c0_12, %c0_13] : memref<128x128xbf16, #tpu.memory_space<vmem>>, vector<128x128xbf16>
    %cst_14 = arith.constant dense<0.000000e+00> : vector<8x128xf32>
    %19 = tpu.matmul %17, %18, %cst_14 {dimension_numbers = #tpu.dot_dimension_numbers<[1], [0], [0], [1], [0, 0, 1, 1], [], []>} : vector<8x128xbf16>, vector<128x128xbf16>, vector<8x128xf32> -> vector<8x128xf32>
    %c0_15 = arith.constant 0 : index
    %c0_16 = arith.constant 0 : index
    %20 = vector.load %arg7[%c0_15, %c0_16] : memref<1x128xf32, #tpu.memory_space<vmem>>, vector<1x128xf32>
    %21 = vector.broadcast %20 : vector<1x128xf32> to vector<8x128xf32>
    %22 = arith.addf %19, %21 : vector<8x128xf32>
    %23 = tpu.iota {dimensions = array<i32: 1>} : vector<8x128xi32>
    %cst_17 = arith.constant 0.000000e+00 : f32
    %24 = vector.broadcast %cst_17 : f32 to vector<8x128xf32>
    %25 = arith.maximumf %22, %24 : vector<8x128xf32>
    %26 = vector.broadcast %cst_17 : f32 to vector<8x128xf32>
    %27 = arith.subf %22, %26 : vector<8x128xf32>
    %28 = arith.cmpf one, %27, %27 : vector<8x128xf32>
    %29 = vector.broadcast %cst_17 : f32 to vector<8x128xf32>
    %30 = arith.addf %22, %29 : vector<8x128xf32>
    %31 = math.absf %27 : vector<8x128xf32>
    %cst_18 = arith.constant 0.000000e+00 : f32
    %32 = vector.broadcast %cst_18 : f32 to vector<8x128xf32>
    %33 = arith.subf %32, %31 : vector<8x128xf32>
    %34 = math.exp %33 : vector<8x128xf32>
    %35 = math.log1p %34 : vector<8x128xf32>
    %36 = arith.addf %25, %35 : vector<8x128xf32>
    %37 = arith.select %28, %30, %36 : vector<8x128xi1>, vector<8x128xf32>
    %cst_19 = arith.constant 0.00999999977 : f32
    %38 = vector.broadcast %cst_19 : f32 to vector<8x128xf32>
    %39 = arith.addf %37, %38 : vector<8x128xf32>
    %c8_i32 = arith.constant 8 : i32
    %40 = vector.broadcast %c8_i32 : i32 to vector<8x128xi32>
    %41 = arith.cmpi sge, %23, %40 : vector<8x128xi32>
    %c16_i32 = arith.constant 16 : i32
    %42 = vector.broadcast %c16_i32 : i32 to vector<8x128xi32>
    %43 = arith.cmpi slt, %23, %42 : vector<8x128xi32>
    %44 = arith.andi %41, %43 : vector<8x128xi1>
    %45 = arith.select %44, %39, %22 : vector<8x128xi1>, vector<8x128xf32>
    %46 = arith.truncf %45 : vector<8x128xf32> to vector<8x128xbf16>
    %c0_20 = arith.constant 0 : index
    %c0_21 = arith.constant 0 : index
    %47 = vector.load %arg8[%c0_20, %c0_21] : memref<8x128xbf16, #tpu.memory_space<vmem>>, vector<8x128xbf16>
    tpu.vector_store %arg8[%c0_20, %c0_21], %46 {strides = array<i32>} : memref<8x128xbf16, #tpu.memory_space<vmem>>, vector<8x128xbf16>,
    return
  }
  func.func @transform_0(%arg0: i32) -> (i32, i32) {
    %c0_i32 = arith.constant 0 : i32
    %c0_i32_0 = arith.constant 0 : i32
    return %arg0, %c0_i32 : i32, i32
  }
  func.func @transform_1(%arg0: i32) -> (i32, i32) {
    %c0_i32 = arith.constant 0 : i32
    %c0_i32_0 = arith.constant 0 : i32
    %c0_i32_1 = arith.constant 0 : i32
    return %c0_i32, %c0_i32_0 : i32, i32
  }
  func.func @transform_2(%arg0: i32) -> (i32, i32) {
    %c0_i32 = arith.constant 0 : i32
    %c0_i32_0 = arith.constant 0 : i32
    %c0_i32_1 = arith.constant 0 : i32
    return %c0_i32, %c0_i32_0 : i32, i32
  }
  func.func @transform_3(%arg0: i32) -> (i32, i32) {
    %c0_i32 = arith.constant 0 : i32
    %c0_i32_0 = arith.constant 0 : i32
    %c0_i32_1 = arith.constant 0 : i32
    return %c0_i32, %c0_i32_0 : i32, i32
  }
  func.func @transform_4(%arg0: i32) -> (i32, i32) {
    %c0_i32 = arith.constant 0 : i32
    %c0_i32_0 = arith.constant 0 : i32
    %c0_i32_1 = arith.constant 0 : i32
    return %c0_i32, %c0_i32_0 : i32, i32
  }
  func.func @transform_5(%arg0: i32) -> (i32, i32) {
    %c0_i32 = arith.constant 0 : i32
    %c0_i32_0 = arith.constant 0 : i32
    %c0_i32_1 = arith.constant 0 : i32
    return %c0_i32, %c0_i32_0 : i32, i32
  }
  func.func @transform_6(%arg0: i32) -> (i32, i32) {
    %c0_i32 = arith.constant 0 : i32
    %c0_i32_0 = arith.constant 0 : i32
    %c0_i32_1 = arith.constant 0 : i32
    return %c0_i32, %c0_i32_0 : i32, i32
  }
  func.func @transform_7(%arg0: i32) -> (i32, i32) {
    %c0_i32 = arith.constant 0 : i32
    %c0_i32_0 = arith.constant 0 : i32
    return %arg0, %c0_i32 : i32, i32
  }
}

</mosaic_0001>

<bundles_post_ra>
// kernel: tpu_custom_call.1
= control target key start
LH: loop header
LB: loop body
LE: loop exit
PB: predicated region body
PF: predicated region fallthrough
CT: control target
= control target key end

     0   :  { %12 = vsyncpa [#allocation3], 0  ;;  %s739_s0 = inlined_call_operand.hbm [shape: f32[8,16], index: 0, kind: input, shape index: {}]   ;;  %s740_s1 = inlined_call_operand.hbm [shape: bf16[16,128], index: 1, kind: input, shape index: {}]   ;;  %s741_s2 = inlined_call_operand.vmem [shape: f32[1,128], index: 2, kind: input, shape index: {}]   ;;  %s742_s3 = inlined_call_operand.hbm [shape: bf16[128,128], index: 3, kind: input, shape index: {}]   ;;  %s743_s4 = inlined_call_operand.vmem [shape: f32[1,128], index: 4, kind: input, shape index: {}]   ;;  %s744_s5 = inlined_call_operand.hbm [shape: bf16[128,128], index: 5, kind: input, shape index: {}]   ;;  %s745_s6 = inlined_call_operand.vmem [shape: f32[1,128], index: 6, kind: input, shape index: {}]   ;;  %s746_s7 = inlined_call_operand.hbm [shape: bf16[8,128], index: 7, kind: output, shape index: {}]  }
   0x1   :  { %13 = vsyncpa [#allocation6], 0 }
   0x2   :  { %14 = vsyncpa [#allocation9], 0 }
   0x3   :  { %15 = vsyncpa [#allocation4], 0  ;;  %s637_s24 = smov [#allocation5]  }
   0x4   :  { %s31_s25 = sshll.u32 %s637_s24, 4  ;;  %s32_s25 = int_to_ptr.vmem [resolvable:$true] %s31_s25 }
   0x5   :  { %s537_s26 = scalar_lea.vmem %s32_s25, 128  ;;  %p542_p1 = scmp.lt.s32.totalorder %s32_s25, %s32_s25 }
   0x6   :  { %p538_p0 = scmp.ne.s32.totalorder %s32_s25, %s537_s26  ;;  %p543_p2 = scmp.lt.s32.totalorder %s537_s26, %s537_s26 }
   0x8   :  { %p544_p3 = por %p543_p2, %p542_p1 }
   0xa   :  { %p545_p4 = pnand %p544_p3, %p538_p0 }
   0xc   :  { %548 = shalt.err (!%p545_p4)
}
   0xd   :  { %s638_s27 = smov 64   ;;  %s639_s28 = smov 4  }
   0xe   :  { %37 = dma.hbm_to_vmem [thread:$0]  %s740_s1, 128, %s32_s25, [#allocation6], %s638_s27, %s638_s27, %s639_s28  }
   0xf   :  { %s640_s8 = smov [#allocation2]   ;;  %s641_s10 = smov [#allocation7]  }
  0x10   :  { %s22_s9 = sshll.u32 %s640_s8, 4  ;;  %s45_s11 = sshll.u32 %s641_s10, 4  ;;  %s23_s9 = int_to_ptr.vmem [resolvable:$true] %s22_s9  ;;  %s46_s11 = int_to_ptr.vmem [resolvable:$true] %s45_s11 }
  0x11   :  { %s557_s12 = scalar_lea.vmem %s23_s9, 128  ;;  %p562_p6 = scmp.lt.s32.totalorder %s23_s9, %s23_s9 }
  0x12   :  { %p558_p5 = scmp.ne.s32.totalorder %s23_s9, %s557_s12  ;;  %p563_p7 = scmp.lt.s32.totalorder %s557_s12, %s557_s12 }
  0x14   :  { %p564_p8 = por %p563_p7, %p562_p6 }
  0x16   :  { %p565_p9 = pnand %p564_p8, %p558_p5 }
  0x18   :  { %568 = shalt.err (!%p565_p9)
}
  0x19   :  { %25 = dma.hbm_to_vmem [thread:$0]  %s739_s0, 128, %s23_s9, [#allocation3]  }
  0x1a   :  { %s577_s15 = scalar_lea.vmem %s46_s11, 1024  ;;  %p582_p11 = scmp.lt.s32.totalorder %s46_s11, %s46_s11 }
  0x1b   :  { %p578_p10 = scmp.ne.s32.totalorder %s46_s11, %s577_s15  ;;  %p583_p12 = scmp.lt.s32.totalorder %s577_s15, %s577_s15 }
  0x1d   :  { %p584_p13 = por %p583_p12, %p582_p11 }
  0x1f   :  { %p585_p0 = pnand %p584_p13, %p578_p10 }
  0x21   :  { %588 = shalt.err (!%p585_p0)
}
  0x22   :  { %51 = dma.hbm_to_vmem [thread:$0]  %s742_s3, 1024, %s46_s11, [#allocation6], %s638_s27, %s638_s27, %s639_s28  }
  0x23   :  { %s642_s17 = smov [#allocation8]  }
  0x24   :  { %s59_s18 = sshll.u32 %s642_s17, 4  ;;  %s60_s18 = int_to_ptr.vmem [resolvable:$true] %s59_s18 }
  0x25   :  { %s597_s19 = scalar_lea.vmem %s60_s18, 1024  ;;  %p602_p2 = scmp.lt.s32.totalorder %s60_s18, %s60_s18 }
  0x26   :  { %p598_p1 = scmp.ne.s32.totalorder %s60_s18, %s597_s19  ;;  %p603_p3 = scmp.lt.s32.totalorder %s597_s19, %s597_s19 }
  0x28   :  { %p604_p4 = por %p603_p3, %p602_p2 }
  0x2a   :  { %p605_p5 = pnand %p604_p4, %p598_p1 }
  0x2c   :  { %608 = shalt.err (!%p605_p5)
}
  0x2d   :  { %65 = dma.hbm_to_vmem [thread:$0]  %s744_s5, 1024, %s60_s18, [#allocation9], %s638_s27, %s638_s27, %s639_s28  }
  0x2e   :  { %629 = dma.done.wait [#allocation3], 128  }
  0x2f   :  { %630 = vsyncadd [#allocation3], 4294967168 }
  0x30   :  { %631 = dma.done.wait [#allocation6], 1152  }
  0x31   :  { %632 = vsyncadd [#allocation6], 4294966144 }
  0x32   :  { %633 = dma.done.wait [#allocation9], 1024  }
  0x33   :  { %634 = vsyncadd [#allocation9], 4294966272  ;;  %v643_v0 = vmov 0.0   ;;  %vm644_vm0 = vmmov 0   ;;  %v508_v1 = vld [vmem:[#allocation5] sm:$0xff]   ;;  %v81_v2 = vld [vmem:[#allocation2] sm:$0xff]  ;;  %v368_v48 = vlaneseq }
  0x34   :  { %453 = vmatprep.subr.bf16.mxu0 %v643_v0  ;;  %455 = vmatprep.mubr.msk.bf16.mxu0 %vm644_vm0, %v643_v0  ;;  %v82_v3 = vpack.c.bf16 %v81_v2, %v81_v2  ;;  %vm98_vm1 = vcmask 130048   ;;  %v509_v4 = vld [vmem:[#allocation7 + $0x38] sm:$0xff]   ;;  %v510_v5 = vld [vmem:[#allocation7 + $0x30] sm:$0xff]   ;;  %v511_v6 = vld [vmem:[#allocation7 + $0x28] sm:$0xff]  }
  0x35   :  { %459 = vmatprep.subr.bf16.mxu1 %v643_v0  ;;  %475 = vmatprep.mubr.msk.bf16.mxu1 %vm644_vm0, %v643_v0  ;;  %v512_v7 = vld [vmem:[#allocation7 + $0x20] sm:$0xff]   ;;  %v513_v8 = vld [vmem:[#allocation7 + $0x18] sm:$0xff]   ;;  %v514_v9 = vld [vmem:[#allocation7 + $0x10] sm:$0xff]   ;;  %v369_v51 = vand.u32 127, %v368_v48 }
  0x36   :  { %454 = vmatpush3.bf16.msra.mxu0 %v508_v1  ;;  %460 = vmatpush3.bf16.msra.mxu1 %v509_v4  ;;  %v515_v10 = vld [vmem:[#allocation7 + $0x8] sm:$0xff]   ;;  %v516_v11 = vld [vmem:[#allocation7] sm:$0xff]   ;;  %v517_v12 = vld [vmem:[#allocation8 + $0x38] sm:$0xff]  }
  0x37   :  { %479 = vmatprep.subr.bf16.mxu0 %v643_v0  ;;  %461 = vmatprep.subr.bf16.mxu1 %v643_v0  ;;  %v518_v13 = vld [vmem:[#allocation8 + $0x30] sm:$0xff]   ;;  %v519_v14 = vld [vmem:[#allocation8 + $0x28] sm:$0xff]   ;;  %v520_v15 = vld [vmem:[#allocation8 + $0x20] sm:$0xff]   ;;  %vm389_vm3 = vcmp.ge.s32.totalorder %v369_v51, 8  ;;  %vm390_vm4 = vcmp.lt.s32.totalorder %v369_v51, 16 }
  0x38   :  { %v521_v16 = vld [vmem:[#allocation8 + $0x18] sm:$0xff]   ;;  %v522_v17 = vld [vmem:[#allocation8 + $0x10] sm:$0xff]   ;;  %v523_v26 = vld [vmem:[#allocation8 + $0x8] sm:$0xff]  }
  0x39   :  { %456 = vmatmul.mubr.msk.bf16.vlgmr.msra.gmra.mxu0 %vm98_vm1, %v82_v3  ;;  %v412_v18 = vld [vmem:[%s741_s2] ss:$0 sm:$0xff]  ;;  %v524_v27 = vld [vmem:[#allocation8] sm:$0xff]   ;;  %vm391_vm6 = vmand %vm389_vm3, %vm390_vm4 }
  0x3a   :  { %495 = vmatprep.mubr.msk.bf16.mxu0 %vm644_vm0, %v643_v0  ;;  %462 = vmatpush3.bf16.msra.mxu1 %v510_v5  ;;  %v415_v28 = vld [vmem:[%s743_s4] ss:$0 sm:$0xff]  ;;  %s645_s4 = smov [#allocation10]  }
  0x3b   :  { %463 = vmatprep.subr.bf16.mxu1 %v643_v0  ;;  %480 = vmatpush3.bf16.msra.mxu0 %v517_v12  ;;  %v424_v36 = vld [vmem:[%s745_s6] ss:$0 sm:$0xff]  ;;  %s401_s6 = sshll.u32 %s645_s4, 4  ;;  %s402_s6 = int_to_ptr.vmem [resolvable:$true] %s401_s6 }
  0x3c   :  { %481 = vmatprep.subr.bf16.mxu0 %v643_v0  ;;  %s609_s24 = scalar_lea.vmem %s402_s6, 64  ;;  %p614_p7 = scmp.lt.s32.totalorder %s402_s6, %s402_s6 }
  0x3d   :  { %p610_p6 = scmp.ne.s32.totalorder %s402_s6, %s609_s24  ;;  %p615_p8 = scmp.lt.s32.totalorder %s609_s24, %s609_s24 }
  0x3e   :  { %464 = vmatpush3.bf16.msra.mxu1 %v511_v6 }
  0x3f   :  { %465 = vmatprep.subr.bf16.mxu1 %v643_v0  ;;  %482 = vmatpush3.bf16.msra.mxu0 %v518_v13  ;;  %p616_p9 = por %p615_p8, %p614_p7 }
  0x40   :  { %483 = vmatprep.subr.bf16.mxu0 %v643_v0 }
  0x41   :  { %p617_p10 = pnand %p616_p9, %p610_p6 }
  0x42   :  { %466 = vmatpush3.bf16.msra.mxu1 %v512_v7 }
  0x43   :  { %467 = vmatprep.subr.bf16.mxu1 %v643_v0  ;;  %484 = vmatpush3.bf16.msra.mxu0 %v519_v14 }
  0x44   :  { %485 = vmatprep.subr.bf16.mxu0 %v643_v0 }
  0x46   :  { %468 = vmatpush3.bf16.msra.mxu1 %v513_v8 }
  0x47   :  { %469 = vmatprep.subr.bf16.mxu1 %v643_v0  ;;  %486 = vmatpush3.bf16.msra.mxu0 %v520_v15 }
  0x48   :  { %487 = vmatprep.subr.bf16.mxu0 %v643_v0 }
  0x4a   :  { %470 = vmatpush3.bf16.msra.mxu1 %v514_v9 }
  0x4b   :  { %471 = vmatprep.subr.bf16.mxu1 %v643_v0  ;;  %488 = vmatpush3.bf16.msra.mxu0 %v521_v16 }
  0x4c   :  { %489 = vmatprep.subr.bf16.mxu0 %v643_v0 }
  0x4e   :  { %472 = vmatpush3.bf16.msra.mxu1 %v515_v10 }
  0x4f   :  { %473 = vmatprep.subr.bf16.mxu1 %v643_v0  ;;  %490 = vmatpush3.bf16.msra.mxu0 %v522_v17 }
  0x50   :  { %491 = vmatprep.subr.bf16.mxu0 %v643_v0 }
  0x52   :  { %474 = vmatpush3.bf16.msra.mxu1 %v516_v11 }
  0x53   :  { %492 = vmatpush3.bf16.msra.mxu0 %v523_v26 }
  0x54   :  { %493 = vmatprep.subr.bf16.mxu0 %v643_v0 }
  0x57   :  { %494 = vmatpush3.bf16.msra.mxu0 %v524_v27 }
  0xf9   :  { %v136_v19 = vpop.f32.mrf.mxu0 }
  0xfa   :  { %v137_v20 = vadd.f32 %v412_v18, %v136_v19 }
  0xfb   :  { %v457_v21 = vpop.f32.mrf.mxu0 }
  0xfc   :  { %v142_v22 = vmax.f32 %v137_v20, 0.0 }
  0xfd   :  { %v139_v23 = vpop.f32.mrf.mxu0 }
  0xfe   :  { %v143_v24 = vpack.c.bf16 %v142_v22, %v142_v22 }
  0xff   :  { %v458_v25 = vpop.f32.mrf.mxu0 }
 0x100   :  { %476 = vmatmul.mubr.bf16.vlgmr.msra.gmra.mxu1 %v143_v24 }
 0x1c0   :  { %v249_v29 = vpop.f32.mrf.mxu1 }
 0x1c1   :  { %v250_v30 = vadd.f32 %v415_v28, %v249_v29 }
 0x1c2   :  { %v477_v31 = vpop.f32.mrf.mxu1 }
 0x1c3   :  { %v255_v32 = vmax.f32 %v250_v30, 0.0 }
 0x1c4   :  { %v252_v33 = vpop.f32.mrf.mxu1 }
 0x1c5   :  { %v256_v34 = vpack.c.bf16 %v255_v32, %v255_v32 }
 0x1c6   :  { %v478_v35 = vpop.f32.mrf.mxu1 }
 0x1c7   :  { %496 = vmatmul.mubr.bf16.vlgmr.msra.gmra.mxu0 %v256_v34 }
 0x287   :  { %v362_v37 = vpop.f32.mrf.mxu0 }
 0x288   :  { %v363_v38 = vadd.f32 %v424_v36, %v362_v37 }
 0x289   :  { %v497_v39 = vpop.f32.mrf.mxu0 }
 0x28a   :  { %v373_v40 = vand.u32 2147483647, %v363_v38  ;;  %v370_v55 = vmax.f32 %v363_v38, 0.0  ;;  %vm371_vm5 = vcmp.ne.f32.partialorder %v363_v38, %v363_v38 }
 0x28b   :  { %v365_v41 = vpop.f32.mrf.mxu0 }
 0x28c   :  { %v374_v42 = vsub.f32 0.0, %v373_v40 }
 0x28d   :  { %v498_v43 = vpop.f32.mrf.mxu0 }
 0x28e   :  { %v375_v44 = vmul.f32 1.442695, %v374_v42 }
 0x290   :  { %525 = vpow2.f32 %v375_v44 }
 0x29d   :  { %v526_v45 = vpop.eup %525 }
 0x29e   :  { %v377_v46 = vadd.f32 1.0, %v526_v45  ;;  %v380_v47 = vmul.f32 -0.5, %v526_v45  ;;  %v383_v50 = vand.u32 2147483647, %v526_v45 }
 0x2a0   :  { %527 = vlog2.f32 %v377_v46  ;;  %v381_v49 = vadd.f32 1.0, %v380_v47  ;;  %vm384_vm2 = vcmp.lt.f32.partialorder %v383_v50, 0.0004427343 }
 0x2a2   :  { %v382_v54 = vmul.f32 %v526_v45, %v381_v49 }
 0x2ad   :  { %v528_v52 = vpop.eup %527 }
 0x2ae   :  { %v379_v53 = vmul.f32 0.6931472, %v528_v52 }
 0x2b0   :  { %v385_v56 = vsel %vm384_vm2, %v382_v54, %v379_v53 }
 0x2b1   :  { %v386_v57 = vadd.f32 %v385_v56, %v370_v55 }
 0x2b3   :  { %v387_v58 = vsel %vm371_vm5, %v363_v38, %v386_v57 }
 0x2b4   :  { %v388_v59 = vadd.f32 0.01, %v387_v58 }
 0x2b6   :  { %v392_v60 = vsel %vm391_vm6, %v388_v59, %v363_v38 }
 0x2b7   :  { %v393_v61 = vpack.c.bf16 %v392_v60, %v392_v60 }
 0x2b9   :  { %394 = vst [vmem:[#allocation10] sm:$0xf] %v393_v61 }
 0x2ba   :  { %620 = shalt.err (!%p617_p10)
}
 0x2bb   :  { %404 = dma.vmem_to_hbm [thread:$0]  %s402_s6, 64, %s746_s7, [#allocation4]  }
 0x2bc   :  { %635 = dma.done.wait [#allocation4], 64  }
 0x2bd   :  { %636 = vsyncadd [#allocation4], 4294967232 }
 0x2be   :  { %408 = vsyncpa [#allocation3], 1 }
 0x2bf   :  { %409 = vsyncpa [#allocation6], 1 }
 0x2c0   :  { %410 = vsyncpa [#allocation9], 1 }
 0x2c1   :  { %411 = vsyncpa [#allocation4], 1 }

</bundles_post_ra>
